<compile_context>
chip_gen: v7x
topology: tpu7x:2x2x1
jax: 0.10.0
libtpu: 0.0.40
codegen_flags: <defaults>
</compile_context>

<pallas_src>
import jax
import jax.numpy as jnp
from jax.experimental import pallas as pl
from jax.experimental.pallas import tpu as pltpu


def _dropout_mul_kernel(x_ref, m_ref, o_ref):
    # x_ref / o_ref: (BB, TM, Cp) tile; m_ref: (BB, 1, Cp) keep*scale mask,
    # broadcast over the M (sublane) axis. Pure VPU multiply; HBM-bound.
    o_ref[...] = x_ref[...] * m_ref[...]


def _sublane_granularity(dtype) -> int:
    # One (8,128) vreg tile packs 32 bits per cell: 8 rows f32, 16 bf16,
    # 32 int8/fp8.
    return max(8, 32 // jnp.dtype(dtype).itemsize)


def _vmem_budgets() -> tuple[int, int]:
    """(stream_budget, vmem_limit): stream_budget bounds the double-buffered
    {x, out} tiles (4 * tile_bytes); vmem_limit is the scoped cap for Mosaic
    (headroom left for the mask buffers + internal scratch)."""
    try:
        cap = int(pltpu.get_tpu_info().vmem_capacity_bytes)
    except Exception:  # pragma: no cover - conservative fallback
        cap = 64 << 20
    if cap <= (64 << 20):      # v7x: 64 MiB physical / 32 MiB scoped default
        budget = 12 << 20
    else:                      # v5e / v6e: 128 MiB physical
        budget = 16 << 20
    vmem_limit = min(cap // 2, budget + (8 << 20))
    return budget, vmem_limit


def _choose_tiles(B: int, M: int, Cp: int, itemsize: int,
                  budget_bytes: int, min_steps: int = 4) -> tuple[int, int]:
    """Pick (bb, tm) jointly: tm = M first (contiguous slabs), then grow bb
    until each tile nears the budget; then split back down until the grid has
    at least `min_steps` steps so megacore sharding / pipelining have work."""
    sub = max(8, 32 // itemsize)
    cdiv = lambda a, b: -(-a // b)
    full_m_bytes = 4 * M * Cp * itemsize          # double-buffered in + out

    if full_m_bytes <= budget_bytes:
        tm = M
        bb = max(1, min(B, budget_bytes // full_m_bytes))
    else:
        bb = 1
        tm = max(sub, (budget_bytes // (4 * Cp * itemsize) // sub) * sub)
        tm = min(tm, M)

    steps = lambda bb_, tm_: cdiv(B, bb_) * cdiv(M, tm_)
    target = min(min_steps, B * cdiv(M, sub))     # achievable upper bound

    while steps(bb, tm) < target and bb > 1:
        bb = max(1, bb // 2)
    prev = None
    while steps(bb, tm) < target and tm > sub and tm != prev:
        prev = tm
        tm = max(sub, ((tm // 2) // sub) * sub)
    return bb, tm


def per_irrep_ref_dropout(
    x: jax.Array,
    p: float,
    training_attr_from_parent: bool,
    work_on_eval_attr_from_parent: bool,
    key: jax.Array | None = None,
) -> jax.Array:
    """JAX/Pallas equivalent of PerIrrepRefDropout.forward.

    x: (B, M, C). Matches x.permute(0,2,1) -> F.dropout1d -> permute back:
    per (batch, channel) a Bernoulli(1-p) draw zeroes the entire length-M
    slice; survivors are scaled by 1/(1-p).

    NOTE: if `key` is None a fixed PRNGKey(0) is used (deterministic mask);
    thread a fresh key per call to match torch's stateful RNG behaviour.
    """
    apply_dropout = work_on_eval_attr_from_parent or training_attr_from_parent
    if (not apply_dropout) or p == 0.0:
        return x
    if p >= 1.0:
        return jnp.zeros_like(x)

    B, M, C = x.shape
    if key is None:
        key = jax.random.PRNGKey(0)

    # Per-(batch, channel) keep*scale mask; scale applied in f32, cast once.
    keep = jax.random.bernoulli(key, 1.0 - p, (B, 1, C))
    mask = (keep.astype(jnp.float32) * (1.0 / (1.0 - p))).astype(x.dtype)

    # Lane-dense channel dim: pad to a multiple of 128 if needed.
    Cp = -(-C // 128) * 128
    if Cp != C:
        x_in = jnp.pad(x, ((0, 0), (0, 0), (0, Cp - C)))
        mask_in = jnp.pad(mask, ((0, 0), (0, 0), (0, Cp - C)))
    else:
        x_in, mask_in = x, mask

    itemsize = jnp.dtype(x.dtype).itemsize
    budget, vmem_limit = _vmem_budgets()
    bb, tm = _choose_tiles(B, M, Cp, itemsize, budget)

    grid = (pl.cdiv(B, bb), pl.cdiv(M, tm))

    out = pl.pallas_call(
        _dropout_mul_kernel,
        out_shape=jax.ShapeDtypeStruct((B, M, Cp), x.dtype),
        grid=grid,
        in_specs=[
            pl.BlockSpec((bb, tm, Cp), lambda b, m: (b, m, 0)),
            pl.BlockSpec((bb, 1, Cp), lambda b, m: (b, 0, 0)),
        ],
        out_specs=pl.BlockSpec((bb, tm, Cp), lambda b, m: (b, m, 0)),
        compiler_params=pltpu.CompilerParams(
            # Mask is precomputed -> grid steps are independent; "parallel"
            # lets Mosaic shard across both v7x TensorCores.
            dimension_semantics=("parallel", "parallel"),
            vmem_limit_bytes=int(vmem_limit),
        ),
    )(x_in, mask_in)

    if Cp != C:
        out = out[:, :, :C]
    return out


if __name__ == "__main__":
    key = jax.random.PRNGKey(0)
    B, M, C = 4, 16, 128  # x_k: (batch, length, irrep/channel)
    x = jax.random.normal(key, (B, M, C), dtype=jnp.float32)

    p = 0.5
    out = per_irrep_ref_dropout(
        x, p,
        training_attr_from_parent=True,
        work_on_eval_attr_from_parent=False,
        key=jax.random.PRNGKey(42),
    )
    out = jax.block_until_ready(out)

    # Sanity: each (batch, channel) column is either all-zero or x * 1/(1-p).
    scale = 1.0 / (1.0 - p)
    col_zero = jnp.all(out == 0.0, axis=1)                          # (B, C)
    col_scaled = jnp.all(jnp.abs(out - x * scale) < 1e-5, axis=1)   # (B, C)
    assert bool(jnp.all(col_zero | col_scaled)), "dropout1d semantics violated"
    # Some channels kept, some dropped (overwhelmingly likely at p=0.5).
    assert bool(jnp.any(col_zero)) and bool(jnp.any(col_scaled))

    # Non-128-multiple channel count exercises the pad/slice path.
    C2 = 96
    x2 = jax.random.normal(jax.random.PRNGKey(1), (2, 24, C2), dtype=jnp.float32)
    out2 = jax.block_until_ready(per_irrep_ref_dropout(
        x2, p, training_attr_from_parent=True,
        work_on_eval_attr_from_parent=False, key=jax.random.PRNGKey(7)))
    cz2 = jnp.all(out2 == 0.0, axis=1)
    cs2 = jnp.all(jnp.abs(out2 - x2 * scale) < 1e-5, axis=1)
    assert bool(jnp.all(cz2 | cs2)), "dropout1d semantics violated (padded C)"

    # Eval path (no dropout) returns the input unchanged.
    out_eval = per_irrep_ref_dropout(
        x, p, training_attr_from_parent=False, work_on_eval_attr_from_parent=False
    )
    assert bool(jnp.all(out_eval == x))

    # p == 1.0 drops everything (matches F.dropout behavior), no ZeroDivisionError.
    out_full = per_irrep_ref_dropout(
        x, 1.0, training_attr_from_parent=True, work_on_eval_attr_from_parent=False
    )
    assert bool(jnp.all(out_full == 0.0))

    print("KERNEL_OK")
</pallas_src>

<mosaic_0001>
module attributes {stable_mosaic.version = 11 : i64} {
  func.func @_dropout_mul_kernel(%arg0: i32, %arg1: i32, %arg2: memref<1x16x128xf32, #tpu.memory_space<vmem>>, %arg3: memref<1x1x128xf32, #tpu.memory_space<vmem>>, %arg4: memref<1x16x128xf32, #tpu.memory_space<vmem>>) attributes {dimension_semantics = [#tpu.dimension_semantics<parallel>, #tpu.dimension_semantics<parallel>], iteration_bounds = array<i64: 4, 1>, scalar_prefetch = 0 : i64, scratch_operands = 0 : i64, tpu.core_type = #tpu.core_type<tc>, window_params = [{transform_indices = @transform_0, window_bounds = array<i64: 1, 16, 128>}, {transform_indices = @transform_1, window_bounds = array<i64: 1, 1, 128>}, {transform_indices = @transform_2, window_bounds = array<i64: 1, 16, 128>}]} {
    %c0 = arith.constant 0 : index
    %c0_0 = arith.constant 0 : index
    %c0_1 = arith.constant 0 : index
    %0 = vector.load %arg2[%c0, %c0_0, %c0_1] : memref<1x16x128xf32, #tpu.memory_space<vmem>>, vector<1x16x128xf32>
    %c0_2 = arith.constant 0 : index
    %c0_3 = arith.constant 0 : index
    %c0_4 = arith.constant 0 : index
    %1 = vector.load %arg3[%c0_2, %c0_3, %c0_4] : memref<1x1x128xf32, #tpu.memory_space<vmem>>, vector<1x1x128xf32>
    %2 = vector.broadcast %1 : vector<1x1x128xf32> to vector<1x16x128xf32>
    %3 = arith.mulf %0, %2 : vector<1x16x128xf32>
    %c0_5 = arith.constant 0 : index
    %c0_6 = arith.constant 0 : index
    %c0_7 = arith.constant 0 : index
    %4 = vector.load %arg4[%c0_5, %c0_6, %c0_7] : memref<1x16x128xf32, #tpu.memory_space<vmem>>, vector<1x16x128xf32>
    tpu.vector_store %arg4[%c0_5, %c0_6, %c0_7], %3 {strides = array<i32>} : memref<1x16x128xf32, #tpu.memory_space<vmem>>, vector<1x16x128xf32>,
    return
  }
  func.func @transform_0(%arg0: i32, %arg1: i32) -> (i32, i32, i32) {
    %c0_i32 = arith.constant 0 : i32
    %c0_i32_0 = arith.constant 0 : i32
    return %arg0, %arg1, %c0_i32 : i32, i32, i32
  }
  func.func @transform_1(%arg0: i32, %arg1: i32) -> (i32, i32, i32) {
    %c0_i32 = arith.constant 0 : i32
    %c0_i32_0 = arith.constant 0 : i32
    %c0_i32_1 = arith.constant 0 : i32
    return %arg0, %c0_i32, %c0_i32_0 : i32, i32, i32
  }
  func.func @transform_2(%arg0: i32, %arg1: i32) -> (i32, i32, i32) {
    %c0_i32 = arith.constant 0 : i32
    %c0_i32_0 = arith.constant 0 : i32
    return %arg0, %arg1, %c0_i32 : i32, i32, i32
  }
}

</mosaic_0001>

<bundles_post_ra>
// kernel: tpu_custom_call.1
= control target key start
LH: loop header
LB: loop body
LE: loop exit
PB: predicated region body
PF: predicated region fallthrough
CT: control target
= control target key end

     0   :  { %7 = vsyncpa [#allocation3], 0  ;;  %s827_s0 = inlined_call_operand.hbm [shape: f32[4,16,128], index: 0, kind: input, shape index: {}]   ;;  %s828_s1 = inlined_call_operand.hbm [shape: f32[4,1,128], index: 1, kind: input, shape index: {}]   ;;  %s829_s2 = inlined_call_operand.hbm [shape: f32[4,16,128], index: 2, kind: output, shape index: {}]  }
   0x1   :  { %9 = vsyncpa [#allocation3 + $0x1], 0 }
   0x2   :  { %10 = vsyncpa [#allocation6], 0 }
   0x3   :  { %12 = vsyncpa [#allocation6 + $0x1], 0 }
   0x4   :  { %13 = vsyncpa [#allocation4], 0 }
   0x5   :  { %15 = vsyncpa [#allocation4 + $0x1], 0  ;;  %s612_s9 = smov 0   ;;  %s614_s10 = smov 0  }
   0x6   :  { %s616_s11 = smov 0   ;;  %s618_s12 = smov 0  }
   0x7   :  { %s620_s13 = smov 0   ;;  %s622_s14 = smov 0  }
   0x8 LB: > { %s352_s15 = sadd.s32 4294967295, %s588_s14   ;;  %s353_s16 = sadd.s32 4294967294, %s588_s14   ;;  %s588_s14 = sphi %s622_s14, %s21_s14   ;;  %s584_s13 = sphi %s620_s13, %s847_s13   ;;  %s580_s12 = sphi %s618_s12, %s846_s12   ;;  %s576_s11 = sphi %s616_s11, %s845_s11   ;;  %s572_s10 = sphi %s614_s10, %s844_s10   ;;  %s568_s9 = sphi %s612_s9, %s843_s9  }
   0x9   : > { %s33_s17 = sadd.s32 1, %s584_s13  ;;  %s42_s18 = sadd.s32 1, %s576_s11 }
   0xa   : > { %p35_p0 = scmp.ge.s32.totalorder %s33_s17, 4  ;;  %p49_p1 = scmp.ne.s32.totalorder %s576_s11, %s572_s10 }
   0xb   : > { %p50_p2 = scmp.eq.s32.totalorder %s588_s14, 0  ;;  %p55_p3 = scmp.ne.s32.totalorder %s572_s10, %s568_s9 }
   0xc   : > { %s849_s17 = smov (%p35_p0, %s33_s17), 0  ;;  %p56_p5 = scmp.eq.s32.totalorder %s352_s15, 0 }
   0xd   : > { %p653_p4 = por %p50_p2, %p49_p1  ;;  %s37_s20 = ssub.s32 %s584_s13, %s849_s17 }
   0xe   : > { %p107_p6 = scmp.eq.s32.totalorder %s352_s15, 3  ;;  %p40_p7 = scmp.eq.s32.totalorder %s37_s20, 0 }
   0xf   : > { %p659_p8 = por %p56_p5, %p55_p3  ;;  %p113_p10 = scmp.eq.s32.totalorder %s353_s16, 3 }
  0x10   : > { %p663_p9 = por %p107_p6, %p49_p1  ;;  %p388_p12 = scmp.lt.s32.totalorder %s588_s14, 4 }
  0x11   : > { %s833_s21 = scalar_select %p659_p8, 1, 0 }
  0x12   : > { %s834_s22 = scalar_select %p663_p9, 1, 0 }
  0x13   : > { %s668_s23 = scalar_select %p40_p7, %s576_s11, %s42_s18  }
  0x14   : > { %p670_p11 = por %p113_p10, %p55_p3  ;;  %s676_s25 = sand.u32 1, %s576_s11  }
  0x15   : > { %s356_s26 = sshll.u32 %s676_s25, 4  ;;  %s369_s27 = sshll.u32 %s584_s13, 8 }
  0x16   : > { %s835_s24 = scalar_select %p670_p11, 1, 0 }
  0x17   : > { %s683_s30 = scalar_lea.hbm %s827_s0, %s369_s27  ;;  %s137_s3 = scalar_lea.vmem [#allocation2], %s356_s26 }
  0x18   : > { %s146_s4 = sshll.u32 %s137_s3, 4  ;;  %p689_p13 = pnand %p388_p12, %p653_p4  ;;  %s685_s4 = int_to_ptr.vmem [resolvable:$true] %s146_s4 }
  0x19   : > { %s134_s6 = scalar_lea.sflag [#allocation3], %s676_s25  ;;  %s442_s7 = scalar_lea.hbm %s683_s30, 256 }
  0x1a   : > { %p443_p1 = scmp.ne.s32.totalorder %s683_s30, %s442_s7  ;;  %p444_p2 = pneg %p689_p13 }
  0x1b   : > { %s447_s16 = scalar_lea.hbm %s827_s0, 1024  ;;  %p448_p4 = scmp.lt.u32.totalorder %s683_s30, %s827_s0 }
  0x1c   : > { %p445_p3 = pnand %p444_p2, %p443_p1  ;;  %p449_p6 = scmp.lt.u32.totalorder %s447_s16, %s442_s7 }
  0x1d   : > { %p451_p10 = scmp.lt.u32.totalorder %s442_s7, %s683_s30 }
  0x1e   : > { %p446_p5 = pneg %p445_p3  ;;  %p450_p7 = por %p449_p6, %p448_p4 }
  0x20   : > { %p452_p12 = por %p451_p10, %p450_p7 }
  0x22   : > { %p453_p0 = pnand %p452_p12, %p446_p5 }
  0x24   : > { %456 = shalt.err (!%p453_p0)
}
  0x25   : > { %s457_s20 = scalar_lea.vmem %s685_s4, 256  ;;  %s590_s26 = smov [#allocation2]  }
  0x26   : > { %p458_p1 = scmp.ne.s32.totalorder %s685_s4, %s457_s20  ;;  %s462_s27 = sshll.u32 %s590_s26, 4  ;;  %s463_s27 = int_to_ptr.vmem [resolvable:$false] %s462_s27 }
  0x27   : > { %s464_s28 = scalar_lea.vmem %s463_s27, 512  ;;  %p465_p9 = scmp.lt.s32.totalorder %s685_s4, %s463_s27 }
  0x28   : > { %p460_p3 = pnand %p458_p1, %p444_p2  ;;  %p466_p4 = scmp.lt.s32.totalorder %s464_s28, %s457_s20 }
  0x2a   : > { %p461_p11 = pneg %p460_p3  ;;  %p467_p6 = por %p466_p4, %p465_p9 }
  0x2c   : > { %p468_p7 = pnand %p467_p6, %p461_p11 }
  0x2e   : > { %471 = shalt.err (!%p468_p7)
}
  0x2f   : > { %s591_s29 = smov 128   ;;  %s592_s3 = smov 8  }
  0x30   : > { %380 = dma.hbm_to_vmem [thread:$0]  (!%p689_p13), %s683_s30, 256, %s685_s4, %s134_s6, %s591_s29, %s591_s29, %s592_s3  }
  0x31   : > { %p171_p0 = scmp.lt.s32.totalorder %s588_s14, 5  ;;  %s359_s7 = sshll.u32 %s584_s13, 4 }
  0x32   : > { %p837_p9 = scmp.ge.s32.totalorder %s588_s14, 1  ;;  %s733_s18 = scalar_lea.hbm %s828_s1, %s359_s7 }
  0x33   : > { %s159_s19 = scalar_lea.vmem [#allocation5], %s676_s25  ;;  %s157_s30 = scalar_lea.sflag [#allocation6], %s676_s25 }
  0x34   : > { %p726_p11 = pnand %p837_p9, %p171_p0  ;;  %s166_s20 = sshll.u32 %s159_s19, 4  ;;  %s167_s20 = int_to_ptr.vmem [resolvable:$true] %s166_s20 }
  0x35   : > { %s472_s4 = scalar_lea.hbm %s733_s18, 16  ;;  %s477_s27 = scalar_lea.hbm %s828_s1, 64 }
  0x36   : > { %s838_s8 = scalar_select %p726_p11, 1, 0 }
  0x37   : > { %p473_p5 = scmp.ne.s32.totalorder %s733_s18, %s472_s4  ;;  %p478_p1 = scmp.lt.u32.totalorder %s733_s18, %s828_s1 }
  0x38   : > { %p479_p3 = scmp.lt.u32.totalorder %s477_s27, %s472_s4  ;;  %p481_p6 = scmp.lt.u32.totalorder %s472_s4, %s733_s18 }
  0x39   : > { %p475_p10 = pnand %p473_p5, %p444_p2 }
  0x3a   : > { %p480_p4 = por %p479_p3, %p478_p1 }
  0x3b   : > { %p476_p12 = pneg %p475_p10 }
  0x3c   : > { %p482_p7 = por %p481_p6, %p480_p4 }
  0x3e   : > { %p483_p0 = pnand %p482_p7, %p476_p12 }
  0x40   : > { %486 = shalt.err (!%p483_p0)
}
  0x41   : > { %s487_s25 = scalar_lea.vmem %s167_s20, 16  ;;  %s593_s3 = smov [#allocation5]  }
  0x42   : > { %p488_p9 = scmp.ne.s32.totalorder %s167_s20, %s487_s25  ;;  %s492_s7 = sshll.u32 %s593_s3, 4  ;;  %s493_s7 = int_to_ptr.vmem [resolvable:$false] %s492_s7 }
  0x43   : > { %s494_s15 = scalar_lea.vmem %s493_s7, 32  ;;  %p495_p8 = scmp.lt.s32.totalorder %s167_s20, %s493_s7 }
  0x44   : > { %p490_p5 = pnand %p488_p9, %p444_p2  ;;  %p496_p11 = scmp.lt.s32.totalorder %s494_s15, %s487_s25 }
  0x46   : > { %p491_p10 = pneg %p490_p5  ;;  %p497_p1 = por %p496_p11, %p495_p8 }
  0x48   : > { %p498_p3 = pnand %p497_p1, %p491_p10 }
  0x4a   : > { %501 = shalt.err (!%p498_p3)
}
  0x4b   : > { %383 = dma.hbm_to_vmem [thread:$0]  (!%p689_p13), %s733_s18, 16, %s167_s20, %s157_s30  }
  0x4c   : > { %p839_p12 = scmp.ne.s32.totalorder %s838_s8, 0 }
  0x4d   : > { %s759_s16 = sand.u32 (!%p839_p12), 1, %s572_s10   ;;  %p840_p2 = scmp.ne.s32.totalorder (!%p839_p12), %s833_s21, 0 }
  0x4e   : > { %175 = sbr.rel (%p839_p12) target bundleno = 115 (0x73), region = 28  ;;  %s361_s19 = sshll.u32 (!%p839_p12), %s759_s16, 4 }
  0x4f   : > { %s178_s4 = scalar_lea.sflag (!%p839_p12), [#allocation3], %s759_s16  ;;  %s181_s6 = scalar_lea.vmem (!%p839_p12), [#allocation2], %s361_s19 }
  0x55   : > { %555 = dma.done.wait (%p840_p2), %s178_s4, 256  }
  0x56   : > { %557 = vsyncadd (%p840_p2), %s178_s4, 4294967040  ;;  %s187_s5 = scalar_lea.sflag [#allocation6], %s759_s16  ;;  %s189_s8 = scalar_lea.vmem [#allocation5], %s759_s16 }
  0x57   : > { %559 = dma.done.wait (%p840_p2), %s187_s5, 16  }
  0x58   : > { %561 = vsyncadd (%p840_p2), %s187_s5, 4294967280  ;;  %s213_s18 = scalar_lea.vmem [#allocation7], %s361_s19  ;;  %s370_s30 = sshll.u32 %s580_s12, 8  ;;  %v216_v0 = vld [vmem:[%s181_s6] sm:$0xff]  ;;  %v217_v2 = vld [vmem:[%s181_s6 + $0x8] sm:$0xff] }
  0x59   : > { %s245_s20 = sshll.u32 %s213_s18, 4  ;;  %v363_v1 = vld [vmem:[%s189_s8] ss:$0 sm:$0xff]  ;;  %s779_s28 = scalar_lea.hbm %s829_s2, %s370_s30  ;;  %s774_s20 = int_to_ptr.vmem [resolvable:$true] %s245_s20 }
  0x5a   : > { %v225_v3 = vmul.f32 %v363_v1, %v216_v0  ;;  %v226_v4 = vmul.f32 %v363_v1, %v217_v2  ;;  %s230_s21 = scalar_lea.sflag [#allocation4], %s759_s16  ;;  %s502_s29 = scalar_lea.vmem %s774_s20, 256 }
  0x5b   : > { %p503_p8 = scmp.ne.s32.totalorder %s774_s20, %s502_s29  ;;  %p841_p13 = scmp.ne.s32.totalorder %s834_s22, 0 }
  0x5c   : > { %227 = vst [vmem:[%s213_s18] sm:$0xff] %v225_v3  ;;  %228 = vst [vmem:[%s213_s18 + $0x8] sm:$0xff] %v226_v4  ;;  %s594_s12 = smov [#allocation7]  }
  0x5d   : > { %p504_p11 = pnand %p503_p8, %p841_p13  ;;  %s506_s25 = sshll.u32 %s594_s12, 4  ;;  %s507_s25 = int_to_ptr.vmem [resolvable:$false] %s506_s25 }
  0x5e   : > { %s508_s3 = scalar_lea.vmem %s507_s25, 512  ;;  %p509_p6 = scmp.lt.s32.totalorder %s774_s20, %s507_s25 }
  0x5f   : > { %p505_p4 = pneg %p504_p11  ;;  %p510_p7 = scmp.lt.s32.totalorder %s508_s3, %s502_s29 }
  0x61   : > { %p511_p0 = por %p510_p7, %p509_p6 }
  0x63   : > { %p512_p9 = pnand %p511_p0, %p505_p4 }
  0x65   : > { %515 = shalt.err (!%p512_p9)
}
  0x66   : > { %s516_s7 = scalar_lea.hbm %s779_s28, 256  ;;  %s520_s4 = scalar_lea.hbm %s829_s2, 1024 }
  0x67   : > { %p517_p5 = scmp.ne.s32.totalorder %s779_s28, %s516_s7  ;;  %p521_p3 = scmp.lt.u32.totalorder %s779_s28, %s829_s2 }
  0x68   : > { %p522_p12 = scmp.lt.u32.totalorder %s520_s4, %s516_s7  ;;  %p524_p8 = scmp.lt.u32.totalorder %s516_s7, %s779_s28 }
  0x69   : > { %p518_p10 = pnand %p517_p5, %p841_p13 }
  0x6a   : > { %p523_p2 = por %p522_p12, %p521_p3 }
  0x6b   : > { %p519_p1 = pneg %p518_p10 }
  0x6c   : > { %p525_p11 = por %p524_p8, %p523_p2 }
  0x6e   : > { %p526_p4 = pnand %p525_p11, %p519_p1 }
  0x70   : > { %529 = shalt.err (!%p526_p4)
}
  0x71   : > { %s595_s8 = smov 128   ;;  %s596_s18 = smov 8  }
  0x72   : > { %375 = dma.vmem_to_hbm [thread:$0]  (%p841_p13), %s774_s20, 256, %s779_s28, %s230_s21, %s595_s8, %s595_s8, %s596_s18  }
  0x73 PF: > { %p389_p6 = scmp.ge.s32.totalorder %s588_s14, 2  ;;  %s260_s30 = sand.u32 1, %s568_s9  }
  0x74   : > { %p842_p7 = scmp.ne.s32.totalorder %s835_s24, 0  ;;  %s261_s26 = scalar_lea.sflag [#allocation4], %s260_s30 }
  0x76   : > { %p385_p0 = pnand %p389_p6, %p842_p7 }
  0x78   : > { %563 = dma.done.wait (!%p385_p0), %s261_s26, 256  }
  0x79   : > { %565 = vsyncadd (!%p385_p0), %s261_s26, 4294967040  ;;  %s21_s14 = sadd.s32 1, %s588_s14   ;;  %s843_s9 = smov %s572_s10 }
  0x7a   : > { %p18_p9 = scmp.ge.s32.totalorder %s21_s14, 6   ;;  %s844_s10 = smov %s576_s11 }
  0x7b   : > { %s845_s11 = smov %s668_s23  ;;  %s846_s12 = smov %s584_s13 }
  0x7c   : > { %s847_s13 = smov %s849_s17  ;;  %20 = sbr.rel (!%p18_p9) target bundleno = 8 (0x8), region = 86 }
  0x83   :  { %266 = vsyncpa [#allocation3], 1 }
  0x84   :  { %268 = vsyncpa [#allocation3 + $0x1], 1 }
  0x85   :  { %269 = vsyncpa [#allocation6], 1 }
  0x86   :  { %271 = vsyncpa [#allocation6 + $0x1], 1 }
  0x87   :  { %272 = vsyncpa [#allocation4], 1 }
  0x88   :  { %274 = vsyncpa [#allocation4 + $0x1], 1 }

</bundles_post_ra>
